<compile_context>
chip_gen: v6e
topology: v6e:2x2x1
jax: 0.10.0
libtpu: 0.0.40
codegen_flags: <defaults>
</compile_context>

<pallas_src>
import jax
import jax.numpy as jnp
from jax.experimental import pallas as pl
from jax.experimental.pallas import tpu as pltpu

_LANES = 128


def _round_up(v, m):
    return (v + m - 1) // m * m


def _cdiv(a, b):
    return (a + b - 1) // b


def mlp_kernel(x_ref, w1_ref, b1_ref, w2_ref, b2_ref, o_ref):
    # x_ref : [TILE_N, n_feature]   (n_feature is tiny, e.g. 2)
    # w1_ref: [n_feature, H_pad]    H_pad = 128-lane-padded hidden dim
    # b1_ref: [1, H_pad]
    # w2_ref: [H_pad, O_pad]        O_pad = 128-lane-padded output dim
    # b2_ref: [1, O_pad]
    # o_ref : [TILE_N, n_output]    <-- unpadded: only real columns hit HBM
    x = x_ref[...]
    w1 = w1_ref[...]
    b1 = b1_ref[...]                       # hoisted: read biases once

    n_rows = x.shape[0]
    n_feature = x.shape[1]
    n_out = o_ref.shape[1]

    # --- Layer 1: K = n_feature contraction on the VPU (broadcast FMAs) -----
    # Pushing a 2-row operand through the systolic array is pure MXU latency;
    # two vmul+vadd per tile are cheaper and keep the MXU free for layer 2.
    # Bias is folded into the accumulator init (saves one vadd).
    h = jnp.broadcast_to(b1, (n_rows, b1.shape[1]))
    for f in range(n_feature):             # static unroll; n_feature is tiny
        h = h + x[:, f:f + 1] * w1[f:f + 1, :]
    h = jnp.maximum(h, 0.0)                # ReLU (VPU)

    # --- Layer 2: lane-dense H_pad x O_pad matmul on the MXU ----------------
    out = jnp.dot(h, w2_ref[...], preferred_element_type=jnp.float32)
    out = out + b2_ref[...]
    # Store only the real output columns (masked 2-lane store in VMEM is
    # trivial; avoids writing 128-lane-padded rows to HBM).
    o_ref[...] = out[:, :n_out].astype(o_ref.dtype)


def pad_params(w1, b1, w2, b2):
    """Lane-pad hidden/output dims to 128 once (exact: ReLU(0)=0 and zero
    rows/cols of W2 contribute nothing).  Call once, reuse across forwards."""
    n_feature, n_hidden = w1.shape
    n_output = w2.shape[1]
    h_pad = _round_up(n_hidden, _LANES)
    o_pad = _round_up(n_output, _LANES)
    w1p = jnp.pad(w1, ((0, 0), (0, h_pad - n_hidden)))
    b1p = jnp.pad(b1, ((0, 0), (0, h_pad - n_hidden)))
    w2p = jnp.pad(w2, ((0, h_pad - n_hidden), (0, o_pad - n_output)))
    b2p = jnp.pad(b2, ((0, 0), (0, o_pad - n_output)))
    return (w1p, b1p, w2p, b2p), n_output


def net_forward(x, w1p, b1p, w2p, b2p, n_output, *, tile_n=4096):
    """x: [N, n_feature] f32; w1p/b1p/w2p/b2p: pre-padded params (pad_params).
    Returns [N, n_output] f32 (weights stored transposed vs. PyTorch so the
    kernel computes plain row-major x @ W)."""
    n, n_feature = x.shape
    h_pad = w1p.shape[1]
    o_pad = w2p.shape[1]

    # ---- Batch tile selection -------------------------------------------
    n8 = _round_up(n, 8)
    # Largest tile up to tile_n, forced to a multiple of 8 sublanes.
    tile = min(_round_up(tile_n, 8), n8)
    # For large N, cap the tile so the grid has >= 4 steps (2 per v7x
    # TensorCore: megacore sharding + DMA/compute overlap within each core).
    # Only applied once a quarter-batch is itself a big tile, so small
    # problems keep a single low-overhead step.
    quarter = _round_up(_cdiv(n8, 4), 8)
    if quarter >= 512:
        tile = min(tile, quarter)
    tile = max(8, _round_up(tile, 8))

    n_p = _round_up(n, tile)
    xp = jnp.pad(x, ((0, n_p - n), (0, 0)))

    # Advisory cost hint so XLA schedules around this tiny custom call.
    flops = 2 * n_p * (n_feature * h_pad + h_pad * o_pad)
    bytes_accessed = 4 * (xp.size + w1p.size + b1p.size + w2p.size + b2p.size
                          + n_p * n_output)
    cost = pl.CostEstimate(flops=flops, transcendentals=0,
                           bytes_accessed=bytes_accessed)

    out = pl.pallas_call(
        mlp_kernel,
        out_shape=jax.ShapeDtypeStruct((n_p, n_output), jnp.float32),
        grid=(n_p // tile,),
        in_specs=[
            pl.BlockSpec((tile, n_feature), lambda i: (i, 0)),   # x: tiled over batch
            pl.BlockSpec((n_feature, h_pad), lambda i: (0, 0)),  # w1: VMEM-resident
            pl.BlockSpec((1, h_pad), lambda i: (0, 0)),          # b1: VMEM-resident
            pl.BlockSpec((h_pad, o_pad), lambda i: (0, 0)),      # w2: VMEM-resident
            pl.BlockSpec((1, o_pad), lambda i: (0, 0)),          # b2: VMEM-resident
        ],
        # Last dim == full array dim (n_output) -> legal block, unpadded HBM write.
        out_specs=pl.BlockSpec((tile, n_output), lambda i: (i, 0)),
        compiler_params=pltpu.CompilerParams(
            dimension_semantics=("parallel",),       # batch rows independent
            vmem_limit_bytes=32 * 1024 * 1024,       # safe on v5e/v6e/v7x
        ),
        cost_estimate=cost,
    )(xp, w1p, b1p, w2p, b2p)

    return out[:n]   # drop padded batch rows; columns are already exact width


def init_params(key, n_feature, n_hidden, n_output):
    """Deterministic init mimicking torch.nn.Linear (uniform +/- 1/sqrt(fan_in)),
    stored transposed ([in, out]) so the kernel computes x @ W."""
    k1, k2, k3, k4 = jax.random.split(key, 4)
    bound1 = 1.0 / jnp.sqrt(n_feature)
    bound2 = 1.0 / jnp.sqrt(n_hidden)
    w1 = jax.random.uniform(k1, (n_feature, n_hidden), jnp.float32, -bound1, bound1)
    b1 = jax.random.uniform(k2, (1, n_hidden), jnp.float32, -bound1, bound1)
    w2 = jax.random.uniform(k3, (n_hidden, n_output), jnp.float32, -bound2, bound2)
    b2 = jax.random.uniform(k4, (1, n_output), jnp.float32, -bound2, bound2)
    return w1, b1, w2, b2


if __name__ == "__main__":
    # classification.py uses Net(n_feature=2, ..., n_output=2) on two 2-D
    # Gaussian blobs of 100 points each; mirror that structure.
    n_feature, n_hidden, n_output = 2, 32, 2
    batch = 200

    key = jax.random.PRNGKey(0)
    k_x, k_p = jax.random.split(key)

    # Synthetic two-blob input akin to the original script.
    base = jnp.ones((batch // 2, n_feature), jnp.float32)
    x0 = 2.0 * base + jax.random.normal(k_x, (batch // 2, n_feature))
    x1 = -2.0 * base + jax.random.normal(jax.random.fold_in(k_x, 1),
                                         (batch // 2, n_feature))
    x = jnp.concatenate([x0, x1], axis=0).astype(jnp.float32)

    w1, b1, w2, b2 = init_params(k_p, n_feature, n_hidden, n_output)
    (w1p, b1p, w2p, b2p), n_out = pad_params(w1, b1, w2, b2)   # pad once

    out = net_forward(x, w1p, b1p, w2p, b2p, n_out)
    out = jax.block_until_ready(out)

    # Pure-JAX reference of the same math (unpadded).
    ref = jnp.maximum(x @ w1 + b1, 0.0) @ w2 + b2
    assert out.shape == (batch, n_output)
    assert jnp.allclose(out, ref, atol=1e-5, rtol=1e-5)

    print("KERNEL_OK")
</pallas_src>

<mosaic_0001>
module attributes {stable_mosaic.version = 11 : i64} {
  func.func @mlp_kernel(%arg0: i32, %arg1: memref<200x2xf32, #tpu.memory_space<vmem>>, %arg2: memref<2x128xf32, #tpu.memory_space<vmem>>, %arg3: memref<1x128xf32, #tpu.memory_space<vmem>>, %arg4: memref<128x128xf32, #tpu.memory_space<vmem>>, %arg5: memref<1x128xf32, #tpu.memory_space<vmem>>, %arg6: memref<200x2xf32, #tpu.memory_space<vmem>>) attributes {dimension_semantics = [#tpu.dimension_semantics<parallel>], iteration_bounds = array<i64: 1>, scalar_prefetch = 0 : i64, scratch_operands = 0 : i64, tpu.core_type = #tpu.core_type<tc>, window_params = [{transform_indices = @transform_0, window_bounds = array<i64: 200, 2>}, {pipeline_mode = #tpu.pipeline_mode<synchronous>, transform_indices = @transform_1, window_bounds = array<i64: 2, 128>}, {pipeline_mode = #tpu.pipeline_mode<synchronous>, transform_indices = @transform_2, window_bounds = array<i64: 1, 128>}, {pipeline_mode = #tpu.pipeline_mode<synchronous>, transform_indices = @transform_3, window_bounds = array<i64: 128, 128>}, {pipeline_mode = #tpu.pipeline_mode<synchronous>, transform_indices = @transform_4, window_bounds = array<i64: 1, 128>}, {transform_indices = @transform_5, window_bounds = array<i64: 200, 2>}]} {
    %c0 = arith.constant 0 : index
    %c0_0 = arith.constant 0 : index
    %0 = vector.load %arg1[%c0, %c0_0] : memref<200x2xf32, #tpu.memory_space<vmem>>, vector<200x2xf32>
    %c0_1 = arith.constant 0 : index
    %c0_2 = arith.constant 0 : index
    %1 = vector.load %arg2[%c0_1, %c0_2] : memref<2x128xf32, #tpu.memory_space<vmem>>, vector<2x128xf32>
    %c0_3 = arith.constant 0 : index
    %c0_4 = arith.constant 0 : index
    %2 = vector.load %arg3[%c0_3, %c0_4] : memref<1x128xf32, #tpu.memory_space<vmem>>, vector<1x128xf32>
    %3 = vector.shape_cast %2 : vector<1x128xf32> to vector<1x128xf32>
    %4 = vector.broadcast %3 : vector<1x128xf32> to vector<200x128xf32>
    %5 = vector.extract_strided_slice %0 {offsets = [0, 0], sizes = [200, 1], strides = [1, 1]} : vector<200x2xf32> to vector<200x1xf32>
    %6 = vector.extract_strided_slice %1 {offsets = [0, 0], sizes = [1, 128], strides = [1, 1]} : vector<2x128xf32> to vector<1x128xf32>
    %7 = vector.broadcast %5 : vector<200x1xf32> to vector<200x128xf32>
    %8 = vector.broadcast %6 : vector<1x128xf32> to vector<200x128xf32>
    %9 = arith.mulf %7, %8 : vector<200x128xf32>
    %10 = arith.addf %4, %9 : vector<200x128xf32>
    %11 = vector.extract_strided_slice %0 {offsets = [0, 1], sizes = [200, 1], strides = [1, 1]} : vector<200x2xf32> to vector<200x1xf32>
    %12 = vector.extract_strided_slice %1 {offsets = [1, 0], sizes = [1, 128], strides = [1, 1]} : vector<2x128xf32> to vector<1x128xf32>
    %13 = vector.broadcast %11 : vector<200x1xf32> to vector<200x128xf32>
    %14 = vector.broadcast %12 : vector<1x128xf32> to vector<200x128xf32>
    %15 = arith.mulf %13, %14 : vector<200x128xf32>
    %16 = arith.addf %10, %15 : vector<200x128xf32>
    %cst = arith.constant 0.000000e+00 : f32
    %17 = vector.broadcast %cst : f32 to vector<200x128xf32>
    %18 = arith.maximumf %16, %17 : vector<200x128xf32>
    %c0_5 = arith.constant 0 : index
    %c0_6 = arith.constant 0 : index
    %19 = vector.load %arg4[%c0_5, %c0_6] : memref<128x128xf32, #tpu.memory_space<vmem>>, vector<128x128xf32>
    %cst_7 = arith.constant dense<0.000000e+00> : vector<200x128xf32>
    %20 = tpu.matmul %18, %19, %cst_7 {dimension_numbers = #tpu.dot_dimension_numbers<[1], [0], [0], [1], [0, 0, 1, 1], [], []>} : vector<200x128xf32>, vector<128x128xf32>, vector<200x128xf32> -> vector<200x128xf32>
    %c0_8 = arith.constant 0 : index
    %c0_9 = arith.constant 0 : index
    %21 = vector.load %arg5[%c0_8, %c0_9] : memref<1x128xf32, #tpu.memory_space<vmem>>, vector<1x128xf32>
    %22 = vector.broadcast %21 : vector<1x128xf32> to vector<200x128xf32>
    %23 = arith.addf %20, %22 : vector<200x128xf32>
    %24 = vector.extract_strided_slice %23 {offsets = [0, 0], sizes = [200, 2], strides = [1, 1]} : vector<200x128xf32> to vector<200x2xf32>
    %c0_10 = arith.constant 0 : index
    %c0_11 = arith.constant 0 : index
    %25 = vector.load %arg6[%c0_10, %c0_11] : memref<200x2xf32, #tpu.memory_space<vmem>>, vector<200x2xf32>
    tpu.vector_store %arg6[%c0_10, %c0_11], %24 {strides = array<i32>} : memref<200x2xf32, #tpu.memory_space<vmem>>, vector<200x2xf32>,
    return
  }
  func.func @transform_0(%arg0: i32) -> (i32, i32) {
    %c0_i32 = arith.constant 0 : i32
    %c0_i32_0 = arith.constant 0 : i32
    return %arg0, %c0_i32 : i32, i32
  }
  func.func @transform_1(%arg0: i32) -> (i32, i32) {
    %c0_i32 = arith.constant 0 : i32
    %c0_i32_0 = arith.constant 0 : i32
    %c0_i32_1 = arith.constant 0 : i32
    return %c0_i32, %c0_i32_0 : i32, i32
  }
  func.func @transform_2(%arg0: i32) -> (i32, i32) {
    %c0_i32 = arith.constant 0 : i32
    %c0_i32_0 = arith.constant 0 : i32
    %c0_i32_1 = arith.constant 0 : i32
    return %c0_i32, %c0_i32_0 : i32, i32
  }
  func.func @transform_3(%arg0: i32) -> (i32, i32) {
    %c0_i32 = arith.constant 0 : i32
    %c0_i32_0 = arith.constant 0 : i32
    %c0_i32_1 = arith.constant 0 : i32
    return %c0_i32, %c0_i32_0 : i32, i32
  }
  func.func @transform_4(%arg0: i32) -> (i32, i32) {
    %c0_i32 = arith.constant 0 : i32
    %c0_i32_0 = arith.constant 0 : i32
    %c0_i32_1 = arith.constant 0 : i32
    return %c0_i32, %c0_i32_0 : i32, i32
  }
  func.func @transform_5(%arg0: i32) -> (i32, i32) {
    %c0_i32 = arith.constant 0 : i32
    %c0_i32_0 = arith.constant 0 : i32
    return %arg0, %c0_i32 : i32, i32
  }
}

</mosaic_0001>

<bundles_post_ra>
// kernel: tpu_custom_call.1
= control target key start
LH: loop header
LB: loop body
LE: loop exit
PB: predicated region body
PF: predicated region fallthrough
CT: control target
= control target key end

     0   :  { %v868_v0 = vmov 0   ;;  %v869_v4 = vmov 0.0   ;;  %v870_v5 = vmov 1   ;;  %vm871_vm0 = vmmov 0   ;;  %s1385_s0 = inlined_call_operand.vmem [shape: f32[200,2], index: 0, kind: input, shape index: {}]   ;;  %s1386_s3 = inlined_call_operand.vmem [shape: f32[128,128], index: 3, kind: input, shape index: {}]   ;;  %s1387_s1 = inlined_call_operand.vmem [shape: f32[2,128], index: 1, kind: input, shape index: {}]   ;;  %s1388_s2 = inlined_call_operand.vmem [shape: f32[1,128], index: 2, kind: input, shape index: {}]   ;;  %s1389_s4 = inlined_call_operand.vmem [shape: f32[1,128], index: 4, kind: input, shape index: {}]   ;;  %s1390_s5 = inlined_call_operand.vmem [shape: f32[200,2], index: 5, kind: output, shape index: {}]  }
   0x1   :  { %842 = vset.pattern.permute.xlu1 %v868_v0  ;;  %840 = vset.pattern.permute.xlu0 %v868_v0  ;;  %v21_v1 = vld [vmem:[%s1385_s0 + $0x8] sm:$0xff]  ;;  %v20_v2 = vld [vmem:[%s1385_s0] sm:$0xff]  ;;  %v426_v6 = vld [vmem:[%s1386_s3 + $0x78] sm:$0xff]  ;;  %v178_v42 = vlaneseq  ;;  %vm624_vm1 = vcmask 15360  }
   0x2   :  { %60 = vperm.xlu1 %842, %v21_v1   ;;  %55 = vperm.xlu0 %840, %v20_v2   ;;  %v33_v3 = vld [vmem:[%s1385_s0 + $0x68] sm:$0xff]  ;;  %v425_v7 = vld [vmem:[%s1386_s3 + $0x70] sm:$0xff]  ;;  %v934_v9 = vld [vmem:[%s1385_s0 + $0x18] sm:$0xff] }
   0x3   :  { %697 = vmatprep.subr.mxu0 %v869_v4  ;;  %804 = vmatprep.subr.mxu1 %v869_v4  ;;  %v424_v8 = vld [vmem:[%s1386_s3 + $0x68] sm:$0xff]  ;;  %v22_v10 = vld [vmem:[%s1385_s0 + $0x10] sm:$0xff]  ;;  %v423_v11 = vld [vmem:[%s1386_s3 + $0x60] sm:$0xff]  ;;  %v179_v43 = vshrl.u32 %v178_v42, 7 }
   0x4   :  { %729 = vmatprep.mubr.msk.f32.mxu0 %vm871_vm0, %v869_v4  ;;  %768 = vmatprep.mubr.msk.f32.mxu1 %vm871_vm0, %v869_v4  ;;  %v950_v12 = vld [vmem:[%s1385_s0 + $0x28] sm:$0xff]  ;;  %v422_v13 = vld [vmem:[%s1386_s3 + $0x58] sm:$0xff]  ;;  %v421_v14 = vld [vmem:[%s1386_s3 + $0x50] sm:$0xff] }
   0x5   :  { %698 = vmatpush3.msra.mxu0 %v426_v6  ;;  %820 = vmatpush3.msra.mxu1 %v426_v6  ;;  %v966_v15 = vld [vmem:[%s1385_s0 + $0x38] sm:$0xff]  ;;  %v420_v16 = vld [vmem:[%s1386_s3 + $0x48] sm:$0xff]  ;;  %v34_v17 = vld [vmem:[%s1385_s0 + $0x70] sm:$0xff]  ;;  %v180_v44 = vsub.s32 0, %v179_v43  ;;  %v334_v47 = vsub.s32 1, %v179_v43 }
   0x6   :  { %120 = vperm.xlu1 %842, %v33_v3   ;;  %841 = vset.pattern.permute.xlu0 %v870_v5  ;;  %v981_v18 = vld [vmem:[%s1385_s0 + $0x48] sm:$0xff]  ;;  %v419_v19 = vld [vmem:[%s1386_s3 + $0x40] sm:$0xff]  ;;  %v35_v20 = vld [vmem:[%s1385_s0 + $0x78] sm:$0xff] }
   0x7   :  { %233 = vperm.xlu0 %841, %v20_v2   ;;  %699 = vmatprep.subr.mxu0 %v869_v4  ;;  %v418_v21 = vld [vmem:[%s1386_s3 + $0x38] sm:$0xff]  ;;  %v417_v23 = vld [vmem:[%s1386_s3 + $0x30] sm:$0xff]  ;;  %v416_v24 = vld [vmem:[%s1386_s3 + $0x28] sm:$0xff] }
   0x8   :  { %700 = vmatpush3.msra.mxu0 %v425_v7  ;;  %805 = vmatprep.subr.mxu1 %v869_v4  ;;  %v998_v22 = vld [vmem:[%s1385_s0 + $0x58] sm:$0xff]  ;;  %v415_v25 = vld [vmem:[%s1386_s3 + $0x20] sm:$0xff]  ;;  %v413_v29 = vld [vmem:[%s1386_s3 + $0x10] sm:$0xff] }
   0x9   :  { %701 = vmatprep.subr.mxu0 %v869_v4  ;;  %821 = vmatpush3.msra.mxu1 %v425_v7  ;;  %v24_v26 = vld [vmem:[%s1385_s0 + $0x20] sm:$0xff]  ;;  %v414_v27 = vld [vmem:[%s1386_s3 + $0x18] sm:$0xff]  ;;  %v412_v30 = vld [vmem:[%s1386_s3 + $0x8] sm:$0xff] }
   0xa   :  { %843 = vset.pattern.permute.xlu1 %v870_v5  ;;  %702 = vmatpush3.msra.mxu0 %v424_v8  ;;  %v36_v28 = vld [vmem:[%s1385_s0 + $0x80] sm:$0xff]  ;;  %v38_v32 = vld [vmem:[%s1385_s0 + $0x90] sm:$0xff]  ;;  %v37_v33 = vld [vmem:[%s1385_s0 + $0x88] sm:$0xff] }
   0xb   :  { %237 = vperm.xlu1 %843, %v21_v1   ;;  %285 = vperm.xlu0 %841, %v33_v3   ;;  %v411_v31 = vld [vmem:[%s1386_s3] sm:$0xff]  ;;  %v26_v35 = vld [vmem:[%s1385_s0 + $0x30] sm:$0xff]  ;;  %v39_v38 = vld [vmem:[%s1385_s0 + $0x98] sm:$0xff] }
   0xc   :  { %806 = vmatprep.subr.mxu1 %v869_v4  ;;  %703 = vmatprep.subr.mxu0 %v869_v4  ;;  %v40_v34 = vld [vmem:[%s1385_s0 + $0xa0] sm:$0xff]  ;;  %v42_v36 = vld [vmem:[%s1385_s0 + $0xb0] sm:$0xff]  ;;  %v41_v40 = vld [vmem:[%s1385_s0 + $0xa8] sm:$0xff] }
   0xd   :  { %704 = vmatpush3.msra.mxu0 %v423_v11  ;;  %822 = vmatpush3.msra.mxu1 %v424_v8  ;;  %v1078_v37 = vld [vmem:[%s1385_s0 + $0xc0] sm:$0xff]  ;;  %v30_v41 = vld [vmem:[%s1385_s0 + $0x50] sm:$0xff]  ;;  %v43_v46 = vld [vmem:[%s1385_s0 + $0xb8] sm:$0xff] }
   0xe   :  { %705 = vmatprep.subr.mxu0 %v869_v4  ;;  %807 = vmatprep.subr.mxu1 %v869_v4  ;;  %v28_v39 = vld [vmem:[%s1385_s0 + $0x40] sm:$0xff] }
   0xf   :  { %844 = vset.pattern.permute.xlu1 %v868_v0  ;;  %245 = vperm.xlu0 %841, %v934_v9   ;;  %v45_v45 = vld [vmem:[%s1387_s1] sm:$0x3] }
  0x10   :  { %65 = vperm.xlu1 %844, %v22_v10   ;;  %706 = vmatpush3.msra.mxu0 %v422_v13  ;;  %v1108_v48 = vrot.slane %v45_v45, %v180_v44  ;;  %v1112_v52 = vrot.slane %v45_v45, %v334_v47  ;;  %v1117_v53 = vld [vmem:[%s1388_s2] ss:$0 sm:$0xff] }
  0x11   :  { %707 = vmatprep.subr.mxu0 %v869_v4  ;;  %823 = vmatpush3.msra.mxu1 %v423_v11  ;;  %v32_v61 = vld [vmem:[%s1385_s0 + $0x60] sm:$0xff] }
  0x12   :  { %708 = vmatpush3.msra.mxu0 %v421_v14  ;;  %808 = vmatprep.subr.mxu1 %v869_v4 }
  0x13   :  { %253 = vperm.xlu0 %841, %v950_v12   ;;  %709 = vmatprep.subr.mxu0 %v869_v4 }
  0x14   :  { %845 = vset.pattern.permute.xlu1 %v870_v5  ;;  %824 = vmatpush3.msra.mxu1 %v422_v13 }
  0x15   :  { %241 = vperm.xlu1 %845, %v22_v10   ;;  %710 = vmatpush3.msra.mxu0 %v420_v16 }
  0x16   :  { %809 = vmatprep.subr.mxu1 %v869_v4  ;;  %711 = vmatprep.subr.mxu0 %v869_v4 }
  0x17   :  { %261 = vperm.xlu0 %841, %v966_v15   ;;  %825 = vmatpush3.msra.mxu1 %v421_v14 }
  0x18   :  { %712 = vmatpush3.msra.mxu0 %v419_v19  ;;  %810 = vmatprep.subr.mxu1 %v869_v4 }
  0x19   :  { %289 = vperm.xlu1 %845, %v34_v17   ;;  %713 = vmatprep.subr.mxu0 %v869_v4 }
  0x1a   :  { %826 = vmatpush3.msra.mxu1 %v420_v16  ;;  %714 = vmatpush3.msra.mxu0 %v418_v21 }
  0x1b   :  { %269 = vperm.xlu0 %841, %v981_v18   ;;  %811 = vmatprep.subr.mxu1 %v869_v4 }
  0x1c   :  { %715 = vmatprep.subr.mxu0 %v869_v4  ;;  %827 = vmatpush3.msra.mxu1 %v419_v19 }
  0x1d   :  { %846 = vset.pattern.permute.xlu1 %v868_v0  ;;  %716 = vmatpush3.msra.mxu0 %v417_v23 }
  0x1e   :  { %130 = vperm.xlu1 %846, %v35_v20   ;;  %812 = vmatprep.subr.mxu1 %v869_v4 }
  0x1f   :  { %277 = vperm.xlu0 %841, %v998_v22   ;;  %717 = vmatprep.subr.mxu0 %v869_v4 }
  0x20   :  { %828 = vmatpush3.msra.mxu1 %v418_v21  ;;  %718 = vmatpush3.msra.mxu0 %v416_v24 }
  0x21   :  { %813 = vmatprep.subr.mxu1 %v869_v4  ;;  %719 = vmatprep.subr.mxu0 %v869_v4 }
  0x22   :  { %847 = vset.pattern.permute.xlu1 %v870_v5  ;;  %829 = vmatpush3.msra.mxu1 %v417_v23 }
  0x23   :  { %293 = vperm.xlu1 %847, %v35_v20   ;;  %863 = vset.pattern.permute.xlu0 %v868_v0 }
  0x24   :  { %125 = vperm.xlu0 %863, %v34_v17   ;;  %720 = vmatpush3.msra.mxu0 %v415_v25 }
  0x25   :  { %814 = vmatprep.subr.mxu1 %v869_v4  ;;  %721 = vmatprep.subr.mxu0 %v869_v4 }
  0x26   :  { %830 = vmatpush3.msra.mxu1 %v416_v24  ;;  %722 = vmatpush3.msra.mxu0 %v414_v27 }
  0x27   :  { %848 = vset.pattern.permute.xlu1 %v868_v0  ;;  %815 = vmatprep.subr.mxu1 %v869_v4 }
  0x28   :  { %75 = vperm.xlu1 %848, %v24_v26   ;;  %70 = vperm.xlu0 %863, %v934_v9  }
  0x29   :  { %723 = vmatprep.subr.mxu0 %v869_v4  ;;  %831 = vmatpush3.msra.mxu1 %v415_v25 }
  0x2a   :  { %724 = vmatpush3.msra.mxu0 %v413_v29  ;;  %816 = vmatprep.subr.mxu1 %v869_v4 }
  0x2b   :  { %725 = vmatprep.subr.mxu0 %v869_v4  ;;  %832 = vmatpush3.msra.mxu1 %v414_v27 }
  0x2c   :  { %849 = vset.pattern.permute.xlu1 %v870_v5  ;;  %135 = vperm.xlu0 %863, %v36_v28  }
  0x2d   :  { %249 = vperm.xlu1 %849, %v24_v26   ;;  %726 = vmatpush3.msra.mxu0 %v412_v30 }
  0x2e   :  { %817 = vmatprep.subr.mxu1 %v869_v4  ;;  %727 = vmatprep.subr.mxu0 %v869_v4 }
  0x2f   :  { %833 = vmatpush3.msra.mxu1 %v413_v29  ;;  %728 = vmatpush3.msra.mxu0 %v411_v31 }
  0x30   :  { %80 = vperm.xlu0 %863, %v950_v12   ;;  %818 = vmatprep.subr.mxu1 %v869_v4 }
  0x31   :  { %297 = vperm.xlu1 %849, %v36_v28   ;;  %834 = vmatpush3.msra.mxu1 %v412_v30 }
  0x32   :  { %819 = vmatprep.subr.mxu1 %v869_v4 }
  0x33   :  { %835 = vmatpush3.msra.mxu1 %v411_v31 }
  0x34   :  { %145 = vperm.xlu0 %863, %v38_v32  }
  0x35   :  { %850 = vset.pattern.permute.xlu1 %v868_v0 }
  0x36   :  { %140 = vperm.xlu1 %850, %v37_v33  }
  0x38   :  { %90 = vperm.xlu0 %863, %v966_v15  }
  0x3a   :  { %851 = vset.pattern.permute.xlu1 %v870_v5 }
  0x3b   :  { %301 = vperm.xlu1 %851, %v37_v33  }
  0x3c   :  { %155 = vperm.xlu0 %863, %v40_v34  }
  0x3f   :  { %852 = vset.pattern.permute.xlu1 %v868_v0 }
  0x40   :  { %85 = vperm.xlu1 %852, %v26_v35   ;;  %100 = vperm.xlu0 %863, %v981_v18  }
  0x44   :  { %853 = vset.pattern.permute.xlu1 %v870_v5  ;;  %165 = vperm.xlu0 %863, %v42_v36  }
  0x45   :  { %257 = vperm.xlu1 %853, %v26_v35  }
  0x48   :  { %110 = vperm.xlu0 %863, %v998_v22  }
  0x49   :  { %305 = vperm.xlu1 %853, %v38_v32  }
  0x4c   :  { %175 = vperm.xlu0 %863, %v1078_v37  }
  0x4d   :  { %854 = vset.pattern.permute.xlu1 %v868_v0 }
  0x4e   :  { %150 = vperm.xlu1 %854, %v39_v38  }
  0x50   :  { %867 = vset.pattern.permute.xlu0 %v870_v5 }
  0x52   :  { %855 = vset.pattern.permute.xlu1 %v870_v5 }
  0x53   :  { %309 = vperm.xlu1 %855, %v39_v38  }
  0x57   :  { %856 = vset.pattern.permute.xlu1 %v868_v0 }
  0x58   :  { %95 = vperm.xlu1 %856, %v28_v39  }
  0x5c   :  { %857 = vset.pattern.permute.xlu1 %v870_v5 }
  0x5d   :  { %265 = vperm.xlu1 %857, %v28_v39  }
  0x61   :  { %313 = vperm.xlu1 %857, %v40_v34  }
  0x65   :  { %858 = vset.pattern.permute.xlu1 %v868_v0 }
  0x66   :  { %160 = vperm.xlu1 %858, %v41_v40  }
  0x6a   :  { %859 = vset.pattern.permute.xlu1 %v870_v5 }
  0x6b   :  { %317 = vperm.xlu1 %859, %v41_v40  }
  0x6f   :  { %860 = vset.pattern.permute.xlu1 %v868_v0 }
  0x70   :  { %105 = vperm.xlu1 %860, %v30_v41  }
  0x74   :  { %861 = vset.pattern.permute.xlu1 %v870_v5 }
  0x75   :  { %273 = vperm.xlu1 %861, %v30_v41  }
  0x79   :  { %321 = vperm.xlu1 %861, %v42_v36  }
  0x7d   :  { %862 = vset.pattern.permute.xlu1 %v868_v0  ;;  %v61_v49 = vpop.permute.xlu1 %60  ;;  %v56_v50 = vpop.permute.xlu0 %55 }
  0x7e   :  { %170 = vperm.xlu1 %862, %v43_v46   ;;  %v182_v51 = vmul.f32 %v1108_v48, %v56_v50  ;;  %v183_v56 = vmul.f32 %v1108_v48, %v61_v49 }
  0x80   :  { %v207_v54 = vadd.f32 %v1117_v53, %v182_v51  ;;  %v208_v62 = vadd.f32 %v1117_v53, %v183_v56 }
  0x81   :  { %v121_v55 = vpop.permute.xlu1 %120 }
  0x82   :  { %864 = vset.pattern.permute.xlu1 %v870_v5  ;;  %v234_v57 = vpop.permute.xlu0 %233  ;;  %v195_v58 = vmul.f32 %v1108_v48, %v121_v55 }
  0x83   :  { %v336_v59 = vmul.f32 %v1112_v52, %v234_v57  ;;  %325 = vperm.xlu1 %864, %v43_v46  }
  0x84   :  { %v220_v2 = vadd.f32 %v1117_v53, %v195_v58 }
  0x85   :  { %v361_v60 = vadd.f32 %v336_v59, %v207_v54 }
  0x86   :  { %v238_v63 = vpop.permute.xlu1 %237  ;;  %v286_v1 = vpop.permute.xlu0 %285 }
  0x87   :  { %v386_v3 = vmax.f32 %v361_v60, 0.0  ;;  %v337_v6 = vmul.f32 %v1112_v52, %v238_v63  ;;  %v349_v7 = vmul.f32 %v1112_v52, %v286_v1  ;;  %865 = vset.pattern.permute.xlu1 %v868_v0 }
  0x88   :  { %115 = vperm.xlu1 %865, %v32_v61  }
  0x89   :  { %v362_v8 = vadd.f32 %v337_v6, %v208_v62  ;;  %v374_v9 = vadd.f32 %v349_v7, %v220_v2  ;;  %730 = vmatmul.mubr.f32.vlgmr.msra.gmra.mxu0 %v386_v3 }
  0x8a   :  { %v246_v10 = vpop.permute.xlu0 %245  ;;  %732 = vmatprep.mubr.msk.f32.mxu0 %vm871_vm0, %v869_v4 }
  0x8b   :  { %v387_v11 = vmax.f32 %v362_v8, 0.0  ;;  %v399_v12 = vmax.f32 %v374_v9, 0.0  ;;  %v66_v13 = vpop.permute.xlu1 %65  ;;  %v339_v33 = vmul.f32 %v1112_v52, %v246_v10 }
  0x8c   :  { %866 = vset.pattern.permute.xlu1 %v870_v5  ;;  %v184_v14 = vmul.f32 %v1108_v48, %v66_v13 }
  0x8d   :  { %281 = vperm.xlu1 %866, %v32_v61   ;;  %733 = vmatmul.mubr.f32.gmra.mxu0 %v387_v11 }
  0x8e   :  { %769 = vmatmul.mubr.f32.vlgmr.msra.gmra.mxu1 %v399_v12  ;;  %v254_v15 = vpop.permute.xlu0 %253  ;;  %735 = vmatprep.mubr.msk.f32.mxu0 %vm871_vm0, %v869_v4  ;;  %v209_v16 = vadd.f32 %v1117_v53, %v184_v14 }
  0x8f   :  { %771 = vmatprep.mubr.msk.f32.mxu1 %vm871_vm0, %v869_v4  ;;  %v341_v55 = vmul.f32 %v1112_v52, %v254_v15 }
  0x90   :  { %v242_v0 = vpop.permute.xlu1 %241 }
  0x91   :  { %v338_v17 = vmul.f32 %v1112_v52, %v242_v0  ;;  %329 = vperm.xlu1 %866, %v1078_v37  }
  0x92   :  { %v1143_v5 = vpop.permute.xlu0 %261 }
  0x93   :  { %v363_v18 = vadd.f32 %v338_v17, %v209_v16  ;;  %v343_v0 = vmul.f32 %v1112_v52, %v1143_v5 }
  0x94   :  { %v290_v19 = vpop.permute.xlu1 %289 }
  0x95   :  { %v388_v20 = vmax.f32 %v363_v18, 0.0  ;;  %v350_v28 = vmul.f32 %v1112_v52, %v290_v19 }
  0x96   :  { %v1145_v21 = vpop.permute.xlu0 %269 }
  0x97   :  { %736 = vmatmul.mubr.f32.gmra.mxu0 %v388_v20 }
  0x98   :  { %738 = vmatprep.mubr.msk.f32.mxu0 %vm871_vm0, %v869_v4 }
  0x99   :  { %v131_v22 = vpop.permute.xlu1 %130 }
  0x9a   :  { %v1149_v23 = vpop.permute.xlu0 %277  ;;  %v197_v26 = vmul.f32 %v1108_v48, %v131_v22 }
  0x9c   :  { %v222_v34 = vadd.f32 %v1117_v53, %v197_v26 }
  0x9e   :  { %v294_v24 = vpop.permute.xlu1 %293 }
  0x9f   :  { %v126_v25 = vpop.permute.xlu0 %125  ;;  %v351_v29 = vmul.f32 %v1112_v52, %v294_v24 }
  0xa0   :  { %v196_v27 = vmul.f32 %v1108_v48, %v126_v25 }
  0xa1   :  { %v376_v38 = vadd.f32 %v351_v29, %v222_v34 }
  0xa2   :  { %v221_v30 = vadd.f32 %v1117_v53, %v196_v27 }
  0xa3   :  { %v76_v31 = vpop.permute.xlu1 %75  ;;  %v71_v32 = vpop.permute.xlu0 %70  ;;  %v401_v47 = vmax.f32 %v376_v38, 0.0 }
  0xa4   :  { %v185_v35 = vmul.f32 %v1108_v48, %v71_v32  ;;  %v375_v36 = vadd.f32 %v350_v28, %v221_v30  ;;  %v186_v37 = vmul.f32 %v1108_v48, %v76_v31 }
  0xa6   :  { %v210_v39 = vadd.f32 %v1117_v53, %v185_v35  ;;  %v400_v40 = vmax.f32 %v375_v36, 0.0  ;;  %v211_v45 = vadd.f32 %v1117_v53, %v186_v37 }
  0xa7   :  { %v136_v41 = vpop.permute.xlu0 %135 }
  0xa8   :  { %v198_v42 = vmul.f32 %v1108_v48, %v136_v41  ;;  %v250_v43 = vpop.permute.xlu1 %249  ;;  %772 = vmatmul.mubr.f32.gmra.mxu1 %v400_v40  ;;  %v364_v44 = vadd.f32 %v339_v33, %v210_v39 }
  0xa9   :  { %v340_v46 = vmul.f32 %v1112_v52, %v250_v43  ;;  %774 = vmatprep.mubr.msk.f32.mxu1 %vm871_vm0, %v869_v4 }
  0xaa   :  { %v389_v49 = vmax.f32 %v364_v44, 0.0  ;;  %v223_v50 = vadd.f32 %v1117_v53, %v198_v42 }
  0xab   :  { %v365_v51 = vadd.f32 %v340_v46, %v211_v45  ;;  %v81_v54 = vpop.permute.xlu0 %80  ;;  %v345_v45 = vmul.f32 %v1112_v52, %v1145_v21 }
  0xac   :  { %v187_v56 = vmul.f32 %v1108_v48, %v81_v54  ;;  %v298_v57 = vpop.permute.xlu1 %297  ;;  %739 = vmatmul.mubr.f32.gmra.mxu0 %v389_v49  ;;  %775 = vmatmul.mubr.f32.gmra.mxu1 %v401_v47 }
  0xad   :  { %v390_v58 = vmax.f32 %v365_v51, 0.0  ;;  %v352_v59 = vmul.f32 %v1112_v52, %v298_v57  ;;  %741 = vmatprep.mubr.msk.f32.mxu0 %vm871_vm0, %v869_v4  ;;  %777 = vmatprep.mubr.msk.f32.mxu1 %vm871_vm0, %v869_v4 }
  0xae   :  { %v212_v60 = vadd.f32 %v1117_v53, %v187_v56 }
  0xaf   :  { %v377_v61 = vadd.f32 %v352_v59, %v223_v50  ;;  %v146_v6 = vpop.permute.xlu0 %145 }
  0xb0   :  { %742 = vmatmul.mubr.f32.gmra.mxu0 %v390_v58  ;;  %v366_v62 = vadd.f32 %v341_v55, %v212_v60  ;;  %v200_v16 = vmul.f32 %v1108_v48, %v146_v6 }
  0xb1   :  { %v402_v63 = vmax.f32 %v377_v61, 0.0  ;;  %v141_v1 = vpop.permute.xlu1 %140  ;;  %744 = vmatprep.mubr.msk.f32.mxu0 %vm871_vm0, %v869_v4 }
  0xb2   :  { %v391_v2 = vmax.f32 %v366_v62, 0.0  ;;  %v199_v3 = vmul.f32 %v1108_v48, %v141_v1  ;;  %v225_v22 = vadd.f32 %v1117_v53, %v200_v16 }
  0xb3   :  { %778 = vmatmul.mubr.f32.gmra.mxu1 %v402_v63  ;;  %v91_v11 = vpop.permute.xlu0 %90 }
  0xb4   :  { %780 = vmatprep.mubr.msk.f32.mxu1 %vm871_vm0, %v869_v4  ;;  %745 = vmatmul.mubr.f32.gmra.mxu0 %v391_v2  ;;  %v224_v8 = vadd.f32 %v1117_v53, %v199_v3  ;;  %v189_v12 = vmul.f32 %v1108_v48, %v91_v11  ;;  %v347_v11 = vmul.f32 %v1112_v52, %v1149_v23 }
  0xb5   :  { %747 = vmatprep.mubr.msk.f32.mxu0 %vm871_vm0, %v869_v4 }
  0xb6   :  { %v302_v7 = vpop.permute.xlu1 %301  ;;  %v214_v17 = vadd.f32 %v1117_v53, %v189_v12 }
  0xb7   :  { %v353_v9 = vmul.f32 %v1112_v52, %v302_v7  ;;  %v156_v33 = vpop.permute.xlu0 %155 }
  0xb8   :  { %v368_v25 = vadd.f32 %v343_v0, %v214_v17  ;;  %v202_v43 = vmul.f32 %v1108_v48, %v156_v33 }
  0xb9   :  { %v378_v10 = vadd.f32 %v353_v9, %v224_v8 }
  0xba   :  { %v393_v5 = vmax.f32 %v368_v25, 0.0  ;;  %v227_v50 = vadd.f32 %v1117_v53, %v202_v43 }
  0xbb   :  { %v403_v13 = vmax.f32 %v378_v10, 0.0  ;;  %v86_v14 = vpop.permute.xlu1 %85  ;;  %v101_v40 = vpop.permute.xlu0 %100 }
  0xbc   :  { %v188_v15 = vmul.f32 %v1108_v48, %v86_v14  ;;  %v191_v41 = vmul.f32 %v1108_v48, %v101_v40 }
  0xbd   :  { %781 = vmatmul.mubr.f32.gmra.mxu1 %v403_v13 }
  0xbe   :  { %783 = vmatprep.mubr.msk.f32.mxu1 %vm871_vm0, %v869_v4  ;;  %v213_v19 = vadd.f32 %v1117_v53, %v188_v15  ;;  %v216_v46 = vadd.f32 %v1117_v53, %v191_v41 }
  0xbf   :  { %v166_v62 = vpop.permute.xlu0 %165 }
  0xc0   :  { %v258_v18 = vpop.permute.xlu1 %257  ;;  %v370_v57 = vadd.f32 %v345_v45, %v216_v46  ;;  %v204_v13 = vmul.f32 %v1108_v48, %v166_v62 }
  0xc1   :  { %v342_v20 = vmul.f32 %v1112_v52, %v258_v18 }
  0xc2   :  { %v395_v60 = vmax.f32 %v370_v57, 0.0  ;;  %v229_v18 = vadd.f32 %v1117_v53, %v204_v13 }
  0xc3   :  { %v367_v24 = vadd.f32 %v342_v20, %v213_v19  ;;  %v111_v6 = vpop.permute.xlu0 %110 }
  0xc4   :  { %v306_v26 = vpop.permute.xlu1 %305  ;;  %v193_v9 = vmul.f32 %v1108_v48, %v111_v6 }
  0xc5   :  { %v392_v27 = vmax.f32 %v367_v24, 0.0  ;;  %v354_v28 = vmul.f32 %v1112_v52, %v306_v26 }
  0xc6   :  { %v218_v14 = vadd.f32 %v1117_v53, %v193_v9 }
  0xc7   :  { %v379_v29 = vadd.f32 %v354_v28, %v225_v22  ;;  %748 = vmatmul.mubr.f32.gmra.mxu0 %v392_v27 }
  0xc8   :  { %750 = vmatprep.mubr.msk.f32.mxu0 %vm871_vm0, %v869_v4  ;;  %v372_v22 = vadd.f32 %v347_v11, %v218_v14 }
  0xc9   :  { %v404_v30 = vmax.f32 %v379_v29, 0.0  ;;  %v151_v31 = vpop.permute.xlu1 %150 }
  0xca   :  { %v201_v32 = vmul.f32 %v1108_v48, %v151_v31  ;;  %v397_v26 = vmax.f32 %v372_v22, 0.0 }
  0xcb   :  { %751 = vmatmul.mubr.f32.gmra.mxu0 %v393_v5  ;;  %784 = vmatmul.mubr.f32.gmra.mxu1 %v404_v30 }
  0xcc   :  { %786 = vmatprep.mubr.msk.f32.mxu1 %vm871_vm0, %v869_v4  ;;  %753 = vmatprep.mubr.msk.f32.mxu0 %vm871_vm0, %v869_v4  ;;  %v226_v35 = vadd.f32 %v1117_v53, %v201_v32 }
  0xce   :  { %v310_v34 = vpop.permute.xlu1 %309 }
  0xcf   :  { %v355_v36 = vmul.f32 %v1112_v52, %v310_v34  ;;  %v176_v34 = vpop.permute.xlu0 %175 }
  0xd1   :  { %v380_v37 = vadd.f32 %v355_v36, %v226_v35  ;;  %v206_v36 = vmul.f32 %v1108_v48, %v176_v34 }
  0xd3   :  { %v405_v38 = vmax.f32 %v380_v37, 0.0  ;;  %v96_v39 = vpop.permute.xlu1 %95  ;;  %v231_v41 = vadd.f32 %v1117_v53, %v206_v36 }
  0xd4   :  { %v190_v42 = vmul.f32 %v1108_v48, %v96_v39 }
  0xd5   :  { %787 = vmatmul.mubr.f32.gmra.mxu1 %v405_v38 }
  0xd6   :  { %789 = vmatprep.mubr.msk.f32.mxu1 %vm871_vm0, %v869_v4  ;;  %v215_v47 = vadd.f32 %v1117_v53, %v190_v42 }
  0xd8   :  { %v266_v44 = vpop.permute.xlu1 %265 }
  0xd9   :  { %v344_v49 = vmul.f32 %v1112_v52, %v266_v44 }
  0xdb   :  { %v369_v51 = vadd.f32 %v344_v49, %v215_v47 }
  0xdc   :  { %v314_v54 = vpop.permute.xlu1 %313 }
  0xdd   :  { %v394_v55 = vmax.f32 %v369_v51, 0.0  ;;  %v356_v56 = vmul.f32 %v1112_v52, %v314_v54 }
  0xdf   :  { %v381_v58 = vadd.f32 %v356_v56, %v227_v50  ;;  %754 = vmatmul.mubr.f32.gmra.mxu0 %v394_v55 }
  0xe0   :  { %756 = vmatprep.mubr.msk.f32.mxu0 %vm871_vm0, %v869_v4 }
  0xe1   :  { %v406_v21 = vmax.f32 %v381_v58, 0.0  ;;  %v161_v59 = vpop.permute.xlu1 %160 }
  0xe2   :  { %v203_v61 = vmul.f32 %v1108_v48, %v161_v59 }
  0xe3   :  { %757 = vmatmul.mubr.f32.gmra.mxu0 %v395_v60  ;;  %790 = vmatmul.mubr.f32.gmra.mxu1 %v406_v21 }
  0xe4   :  { %792 = vmatprep.mubr.msk.f32.mxu1 %vm871_vm0, %v869_v4  ;;  %759 = vmatprep.mubr.msk.f32.mxu0 %vm871_vm0, %v869_v4  ;;  %v228_v1 = vadd.f32 %v1117_v53, %v203_v61 }
  0xe6   :  { %v318_v63 = vpop.permute.xlu1 %317 }
  0xe7   :  { %v357_v2 = vmul.f32 %v1112_v52, %v318_v63 }
  0xe9   :  { %v382_v3 = vadd.f32 %v357_v2, %v228_v1 }
  0xeb   :  { %v407_v7 = vmax.f32 %v382_v3, 0.0  ;;  %v106_v8 = vpop.permute.xlu1 %105 }
  0xec   :  { %v192_v10 = vmul.f32 %v1108_v48, %v106_v8 }
  0xed   :  { %793 = vmatmul.mubr.f32.gmra.mxu1 %v407_v7 }
  0xee   :  { %795 = vmatprep.mubr.msk.f32.mxu1 %vm871_vm0, %v869_v4  ;;  %v217_v15 = vadd.f32 %v1117_v53, %v192_v10 }
  0xf0   :  { %v274_v12 = vpop.permute.xlu1 %273 }
  0xf1   :  { %v346_v0 = vmul.f32 %v1112_v52, %v274_v12 }
  0xf3   :  { %v371_v16 = vadd.f32 %v346_v0, %v217_v15 }
  0xf4   :  { %v322_v17 = vpop.permute.xlu1 %321 }
  0xf5   :  { %v396_v19 = vmax.f32 %v371_v16, 0.0  ;;  %v358_v20 = vmul.f32 %v1112_v52, %v322_v17 }
  0xf7   :  { %v383_v24 = vadd.f32 %v358_v20, %v229_v18  ;;  %760 = vmatmul.mubr.f32.gmra.mxu0 %v396_v19 }
  0xf8   :  { %762 = vmatprep.mubr.msk.f32.mxu0 %vm871_vm0, %v869_v4 }
  0xf9   :  { %v408_v23 = vmax.f32 %v383_v24, 0.0  ;;  %v171_v25 = vpop.permute.xlu1 %170 }
  0xfa   :  { %v205_v27 = vmul.f32 %v1108_v48, %v171_v25 }
  0xfb   :  { %763 = vmatmul.mubr.f32.gmra.mxu0 %v397_v26  ;;  %796 = vmatmul.mubr.f32.gmra.mxu1 %v408_v23 }
  0xfc   :  { %798 = vmatprep.mubr.msk.f32.mxu1 %vm871_vm0, %v869_v4  ;;  %765 = vmatprep.mubr.msk.f32.mxu0 %vm871_vm0, %v869_v4  ;;  %v230_v29 = vadd.f32 %v1117_v53, %v205_v27 }
  0xfe   :  { %v326_v28 = vpop.permute.xlu1 %325 }
  0xff   :  { %v359_v5 = vmul.f32 %v1112_v52, %v326_v28 }
 0x101   :  { %v384_v30 = vadd.f32 %v359_v5, %v230_v29 }
 0x103   :  { %v409_v31 = vmax.f32 %v384_v30, 0.0  ;;  %v116_v32 = vpop.permute.xlu1 %115 }
 0x104   :  { %v194_v33 = vmul.f32 %v1108_v48, %v116_v32 }
 0x105   :  { %799 = vmatmul.mubr.f32.gmra.mxu1 %v409_v31 }
 0x106   :  { %801 = vmatprep.mubr.msk.f32.mxu1 %vm871_vm0, %v869_v4  ;;  %v219_v37 = vadd.f32 %v1117_v53, %v194_v33  ;;  %v1258_v4 = vld [vmem:[%s1389_s4] ss:$0 sm:$0xff] }
 0x108   :  { %v282_v35 = vpop.permute.xlu1 %281 }
 0x109   :  { %v348_v38 = vmul.f32 %v1112_v52, %v282_v35 }
 0x10b   :  { %v373_v39 = vadd.f32 %v348_v38, %v219_v37 }
 0x10c   :  { %v330_v40 = vpop.permute.xlu1 %329 }
 0x10d   :  { %v398_v42 = vmax.f32 %v373_v39, 0.0  ;;  %v360_v43 = vmul.f32 %v1112_v52, %v330_v40 }
 0x10f   :  { %v385_v44 = vadd.f32 %v360_v43, %v231_v41  ;;  %766 = vmatmul.mubr.f32.gmra.mxu0 %v398_v42 }
 0x111   :  { %v410_v45 = vmax.f32 %v385_v44, 0.0 }
 0x113   :  { %802 = vmatmul.mubr.f32.gmra.mxu1 %v410_v45 }
 0x149   :  { %v500_v48 = vpop.f32.mrf.mxu0 }
 0x14a   :  { %v501_v46 = vadd.f32 %v1258_v4, %v500_v48 }
 0x14b   :  { %v731_v47 = vpop.f32.mrf.mxu0 }
 0x14c   :  { %625 = vst.msk [vmem:[%s1390_s5] sm:$0xff] %vm624_vm1, %v501_v46 }
 0x14d   :  { %v505_v52 = vpop.f32.mrf.mxu0 }
 0x14e   :  { %v506_v53 = vadd.f32 %v1258_v4, %v505_v52  ;;  %v565_v49 = vpop.f32.mrf.mxu1 }
 0x14f   :  { %v566_v50 = vadd.f32 %v1258_v4, %v565_v49  ;;  %v734_v51 = vpop.f32.mrf.mxu0 }
 0x150   :  { %626 = vst.msk [vmem:[%s1390_s5 + $0x8] sm:$0xff] %vm624_vm1, %v506_v53  ;;  %v770_v54 = vpop.f32.mrf.mxu1 }
 0x151   :  { %638 = vst.msk [vmem:[%s1390_s5 + $0x68] sm:$0xff] %vm624_vm1, %v566_v50 }
 0x157   :  { %v510_v55 = vpop.f32.mrf.mxu0 }
 0x158   :  { %v511_v56 = vadd.f32 %v1258_v4, %v510_v55 }
 0x159   :  { %v737_v57 = vpop.f32.mrf.mxu0 }
 0x15a   :  { %627 = vst.msk [vmem:[%s1390_s5 + $0x10] sm:$0xff] %vm624_vm1, %v511_v56 }
 0x168   :  { %v570_v58 = vpop.f32.mrf.mxu1 }
 0x169   :  { %v571_v21 = vadd.f32 %v1258_v4, %v570_v58 }
 0x16a   :  { %v773_v59 = vpop.f32.mrf.mxu1 }
 0x16b   :  { %639 = vst.msk [vmem:[%s1390_s5 + $0x70] sm:$0xff] %vm624_vm1, %v571_v21 }
 0x16c   :  { %v515_v60 = vpop.f32.mrf.mxu0  ;;  %v575_v61 = vpop.f32.mrf.mxu1 }
 0x16d   :  { %v516_v62 = vadd.f32 %v1258_v4, %v515_v60  ;;  %v576_v63 = vadd.f32 %v1258_v4, %v575_v61 }
 0x16e   :  { %v740_v1 = vpop.f32.mrf.mxu0  ;;  %v776_v2 = vpop.f32.mrf.mxu1 }
 0x16f   :  { %628 = vst.msk [vmem:[%s1390_s5 + $0x18] sm:$0xff] %vm624_vm1, %v516_v62  ;;  %640 = vst.msk [vmem:[%s1390_s5 + $0x78] sm:$0xff] %vm624_vm1, %v576_v63 }
 0x170   :  { %v520_v3 = vpop.f32.mrf.mxu0 }
 0x171   :  { %v521_v6 = vadd.f32 %v1258_v4, %v520_v3 }
 0x172   :  { %v743_v7 = vpop.f32.mrf.mxu0 }
 0x173   :  { %629 = vst.msk [vmem:[%s1390_s5 + $0x20] sm:$0xff] %vm624_vm1, %v521_v6  ;;  %v580_v8 = vpop.f32.mrf.mxu1 }
 0x174   :  { %v581_v9 = vadd.f32 %v1258_v4, %v580_v8  ;;  %v525_v10 = vpop.f32.mrf.mxu0 }
 0x175   :  { %v779_v11 = vpop.f32.mrf.mxu1  ;;  %v526_v12 = vadd.f32 %v1258_v4, %v525_v10 }
 0x176   :  { %641 = vst.msk [vmem:[%s1390_s5 + $0x80] sm:$0xff] %vm624_vm1, %v581_v9  ;;  %v746_v13 = vpop.f32.mrf.mxu0 }
 0x177   :  { %630 = vst.msk [vmem:[%s1390_s5 + $0x28] sm:$0xff] %vm624_vm1, %v526_v12 }
 0x17d   :  { %v585_v14 = vpop.f32.mrf.mxu1 }
 0x17e   :  { %v586_v15 = vadd.f32 %v1258_v4, %v585_v14 }
 0x17f   :  { %v782_v0 = vpop.f32.mrf.mxu1 }
 0x180   :  { %642 = vst.msk [vmem:[%s1390_s5 + $0x88] sm:$0xff] %vm624_vm1, %v586_v15 }
 0x187   :  { %v530_v16 = vpop.f32.mrf.mxu0 }
 0x188   :  { %v531_v17 = vadd.f32 %v1258_v4, %v530_v16 }
 0x189   :  { %v749_v18 = vpop.f32.mrf.mxu0 }
 0x18a   :  { %631 = vst.msk [vmem:[%s1390_s5 + $0x30] sm:$0xff] %vm624_vm1, %v531_v17 }
 0x18b   :  { %v535_v19 = vpop.f32.mrf.mxu0  ;;  %v590_v20 = vpop.f32.mrf.mxu1 }
 0x18c   :  { %v536_v22 = vadd.f32 %v1258_v4, %v535_v19  ;;  %v591_v24 = vadd.f32 %v1258_v4, %v590_v20 }
 0x18d   :  { %v752_v23 = vpop.f32.mrf.mxu0  ;;  %v785_v25 = vpop.f32.mrf.mxu1 }
 0x18e   :  { %632 = vst.msk [vmem:[%s1390_s5 + $0x38] sm:$0xff] %vm624_vm1, %v536_v22  ;;  %643 = vst.msk [vmem:[%s1390_s5 + $0x90] sm:$0xff] %vm624_vm1, %v591_v24 }
 0x195   :  { %v595_v26 = vpop.f32.mrf.mxu1 }
 0x196   :  { %v596_v27 = vadd.f32 %v1258_v4, %v595_v26 }
 0x197   :  { %v788_v28 = vpop.f32.mrf.mxu1 }
 0x198   :  { %644 = vst.msk [vmem:[%s1390_s5 + $0x98] sm:$0xff] %vm624_vm1, %v596_v27 }
 0x19f   :  { %v540_v29 = vpop.f32.mrf.mxu0 }
 0x1a0   :  { %v541_v5 = vadd.f32 %v1258_v4, %v540_v29 }
 0x1a1   :  { %v755_v30 = vpop.f32.mrf.mxu0 }
 0x1a2   :  { %633 = vst.msk [vmem:[%s1390_s5 + $0x40] sm:$0xff] %vm624_vm1, %v541_v5 }
 0x1a3   :  { %v545_v31 = vpop.f32.mrf.mxu0  ;;  %v600_v32 = vpop.f32.mrf.mxu1 }
 0x1a4   :  { %v546_v33 = vadd.f32 %v1258_v4, %v545_v31  ;;  %v601_v34 = vadd.f32 %v1258_v4, %v600_v32 }
 0x1a5   :  { %v758_v35 = vpop.f32.mrf.mxu0  ;;  %v791_v36 = vpop.f32.mrf.mxu1 }
 0x1a6   :  { %634 = vst.msk [vmem:[%s1390_s5 + $0x48] sm:$0xff] %vm624_vm1, %v546_v33  ;;  %645 = vst.msk [vmem:[%s1390_s5 + $0xa0] sm:$0xff] %vm624_vm1, %v601_v34 }
 0x1ad   :  { %v605_v37 = vpop.f32.mrf.mxu1 }
 0x1ae   :  { %v606_v38 = vadd.f32 %v1258_v4, %v605_v37 }
 0x1af   :  { %v794_v39 = vpop.f32.mrf.mxu1 }
 0x1b0   :  { %646 = vst.msk [vmem:[%s1390_s5 + $0xa8] sm:$0xff] %vm624_vm1, %v606_v38 }
 0x1b7   :  { %v550_v40 = vpop.f32.mrf.mxu0 }
 0x1b8   :  { %v551_v41 = vadd.f32 %v1258_v4, %v550_v40 }
 0x1b9   :  { %v761_v42 = vpop.f32.mrf.mxu0 }
 0x1ba   :  { %635 = vst.msk [vmem:[%s1390_s5 + $0x50] sm:$0xff] %vm624_vm1, %v551_v41 }
 0x1bb   :  { %v555_v43 = vpop.f32.mrf.mxu0  ;;  %v610_v44 = vpop.f32.mrf.mxu1 }
 0x1bc   :  { %v556_v45 = vadd.f32 %v1258_v4, %v555_v43  ;;  %v611_v48 = vadd.f32 %v1258_v4, %v610_v44 }
 0x1bd   :  { %v764_v46 = vpop.f32.mrf.mxu0  ;;  %v797_v47 = vpop.f32.mrf.mxu1 }
 0x1be   :  { %636 = vst.msk [vmem:[%s1390_s5 + $0x58] sm:$0xff] %vm624_vm1, %v556_v45  ;;  %647 = vst.msk [vmem:[%s1390_s5 + $0xb0] sm:$0xff] %vm624_vm1, %v611_v48 }
 0x1c5   :  { %v615_v52 = vpop.f32.mrf.mxu1 }
 0x1c6   :  { %v616_v53 = vadd.f32 %v1258_v4, %v615_v52 }
 0x1c7   :  { %v800_v49 = vpop.f32.mrf.mxu1 }
 0x1c8   :  { %648 = vst.msk [vmem:[%s1390_s5 + $0xb8] sm:$0xff] %vm624_vm1, %v616_v53 }
 0x1cf   :  { %v560_v50 = vpop.f32.mrf.mxu0 }
 0x1d0   :  { %v561_v51 = vadd.f32 %v1258_v4, %v560_v50 }
 0x1d1   :  { %v767_v54 = vpop.f32.mrf.mxu0 }
 0x1d2   :  { %637 = vst.msk [vmem:[%s1390_s5 + $0x60] sm:$0xff] %vm624_vm1, %v561_v51 }
 0x1d3   :  { %v620_v55 = vpop.f32.mrf.mxu1 }
 0x1d4   :  { %v621_v56 = vadd.f32 %v1258_v4, %v620_v55 }
 0x1d5   :  { %v803_v57 = vpop.f32.mrf.mxu1 }
 0x1d6   :  { %649 = vst.msk [vmem:[%s1390_s5 + $0xc0] sm:$0xff] %vm624_vm1, %v621_v56 }

</bundles_post_ra>
